<compile_context>
chip_gen: v7x
topology: tpu7x:2x2x1
jax: 0.10.0
libtpu: 0.0.40
codegen_flags: <defaults>
</compile_context>

<pallas_src>
import functools

import jax
import jax.numpy as jnp
import numpy as np
from jax.experimental import pallas as pl
from jax.experimental.pallas import tpu as pltpu


def _norm_kernel(gd_ref, gs_ref, adj_ref, norm_ref):
    """Per-destination-node normalizers for one [TM, N] tile of adj."""
    adj = adj_ref[...].astype(jnp.float32)                 # [TM, N]
    s = jnp.tanh(gd_ref[...] + gs_ref[...])                # [TM,1]+[1,N] -> [TM,N]
    deg = jnp.sum(adj, axis=1, keepdims=True)              # [TM, 1]
    ssum = jnp.sum(adj * s, axis=1, keepdims=True)         # [TM, 1]
    re_rowsum = 0.5 * (deg + ssum)                         # sum_u adj*(1+s)/2
    ir_rowsum = deg - re_rowsum                            # sum_u adj*(1-s)/2
    norm_ref[:, 0:1] = jax.lax.rsqrt(jnp.maximum(re_rowsum, 1.0))
    norm_ref[:, 1:2] = jax.lax.rsqrt(jnp.maximum(ir_rowsum, 1.0))


def _prop_kernel(gd_ref, gs_ref, adj_ref, nfull_ref, nblk_ref, x_ref, out_ref,
                 *, feat):
    """One low-pass propagation step for a block of TM destination rows."""
    adj = adj_ref[...].astype(jnp.float32)                 # [TM, N]
    s = jnp.tanh(gd_ref[...] + gs_ref[...])                # [TM, N]
    t = adj * s
    re_s = 0.5 * (adj + t)                                 # adj * (1+s)/2
    ir_s = adj - re_s                                      # adj * (1-s)/2

    # Source-side norm scaling of the resident features, then one matmul each.
    re_x = nfull_ref[:, 0:1] * x_ref[:, :feat]             # [N, F]
    ir_x = nfull_ref[:, 1:2] * x_ref[:, feat:]             # [N, F]
    re_y = jnp.dot(re_s, re_x, preferred_element_type=jnp.float32)  # [TM, F]
    ir_y = jnp.dot(ir_s, ir_x, preferred_element_type=jnp.float32)  # [TM, F]

    # Destination-side scaling; one lane-dense [TM, 2F] output slab.
    out_ref[:, :feat] = nblk_ref[:, 0:1] * re_y
    out_ref[:, feat:] = nblk_ref[:, 1:2] * ir_y


def _round_up(x, m):
    return (x + m - 1) // m * m


def esgnn_layer_pallas(re_h, ir_h, adj, weight, bias, iter_lowpass=1,
                       tm_max=256):
    """re_h, ir_h: [N, F]; adj: [N, N] with adj[dst, src]=1; weight: [1, 2*in_dim];
    bias: [1]. Returns (re_h_new, ir_h_new), each [N, F]."""
    N, F = re_h.shape
    in_dim = 2 * F
    f32 = jnp.float32

    # Row-block tile: multiple of 16 (bf16 sublane packing), capped at tm_max.
    TM = _round_up(min(tm_max, _round_up(N, 16)), 16)
    N_pad = _round_up(N, TM)
    nb = N_pad // TM
    pad_n = N_pad - N

    h = jnp.concatenate([re_h, ir_h], axis=1).astype(f32)            # [N, in_dim]
    h = jnp.pad(h, ((0, pad_n), (0, 0)))                             # [N_pad, in_dim]
    # 0/1 adjacency is exact in bf16: halves HBM traffic of the dominant N^2
    # stream and the VMEM footprint of the streamed tile.
    adj_p = jnp.pad(adj.astype(f32),
                    ((0, pad_n), (0, pad_n))).astype(jnp.bfloat16)   # [N_pad, N_pad]

    # Fused gate projection: one [N, in_dim] @ [in_dim, 2] matmul (tiny).
    w2 = jnp.concatenate([weight[:, :in_dim].astype(f32).T,          # acts on dst h
                          weight[:, in_dim:].astype(f32).T], axis=1)  # acts on src h
    gate = h @ w2                                                    # [N_pad, 2]
    gd_col = gate[:, 0:1] + bias.astype(f32).reshape(1, 1)           # [N_pad, 1]
    gs_row = gate[:, 1:2].T                                          # [1, N_pad]

    grid = (nb,)
    gd_spec = pl.BlockSpec((TM, 1), lambda i: (i, 0))
    gs_spec = pl.BlockSpec((1, N_pad), lambda i: (0, 0))
    adj_spec = pl.BlockSpec((TM, N_pad), lambda i: (i, 0))

    # Rough VMEM working-set estimate; raise the scoped limit only when the
    # default (16 MiB v5e / 32 MiB v6e,v7x) would be exceeded, with headroom.
    est = (2 * TM * N_pad * 2               # double-buffered bf16 adj tile
           + 5 * TM * N_pad * 4             # s / re_s / ir_s + temporaries (f32)
           + 2 * N_pad * (in_dim + 4) * 4   # resident features, gate, norms
           + 4 * TM * in_dim * 4)           # double-buffered output tile
    vlim = None if est <= 24 * 2**20 else int(min(est * 5 // 4, 96 * 2**20))
    cparams = pltpu.CompilerParams(dimension_semantics=("parallel",),
                                   vmem_limit_bytes=vlim)

    # Pass 1: per-node norms (re_norm, ir_norm) -> [N_pad, 2].
    norms = pl.pallas_call(
        _norm_kernel,
        out_shape=jax.ShapeDtypeStruct((N_pad, 2), f32),
        grid=grid,
        in_specs=[gd_spec, gs_spec, adj_spec],
        out_specs=pl.BlockSpec((TM, 2), lambda i: (i, 0)),
        compiler_params=cparams,
    )(gd_col, gs_row, adj_p)

    # Pass 2: low-pass propagation.  Edge weights (gd/gs/norms) are fixed
    # across iterations; each dst-row block needs the previous iteration's
    # features of ALL src nodes, so iter_lowpass > 1 loops at the wrapper level.
    prop = pl.pallas_call(
        functools.partial(_prop_kernel, feat=F),
        out_shape=jax.ShapeDtypeStruct((N_pad, in_dim), f32),
        grid=grid,
        in_specs=[gd_spec, gs_spec, adj_spec,
                  pl.BlockSpec((N_pad, 2), lambda i: (0, 0)),        # norms (src, full)
                  pl.BlockSpec((TM, 2), lambda i: (i, 0)),           # norms (dst block)
                  pl.BlockSpec((N_pad, in_dim), lambda i: (0, 0))],  # features (full)
        out_specs=pl.BlockSpec((TM, in_dim), lambda i: (i, 0)),
        compiler_params=cparams,
    )

    x = h
    for _ in range(iter_lowpass):
        x = prop(gd_col, gs_row, adj_p, norms, norms, x)

    return x[:N, :F], x[:N, F:]


def esgnn_layer_ref(re_h, ir_h, src, dst, weight, bias, num_nodes, iter_lowpass=1):
    """Pure-JAX edge-list reference mirroring the DGL semantics."""
    h = jnp.concatenate([re_h, ir_h], axis=1)
    z = jnp.concatenate([h[dst], h[src]], axis=1)        # [E, 2*in_dim]
    s = jnp.tanh(z @ weight.T + bias)                    # [E, 1]
    re_s = (1.0 + s) * 0.5
    ir_s = (1.0 - s) * 0.5
    re_norm = jax.ops.segment_sum(re_s[:, 0], dst, num_segments=num_nodes)
    ir_norm = jax.ops.segment_sum(ir_s[:, 0], dst, num_segments=num_nodes)
    re_norm = jnp.maximum(re_norm, 1.0) ** -0.5
    ir_norm = jnp.maximum(ir_norm, 1.0) ** -0.5
    re_e = re_s[:, 0] * re_norm[dst] * re_norm[src]
    ir_e = ir_s[:, 0] * ir_norm[dst] * ir_norm[src]
    for _ in range(iter_lowpass):
        re_h = jax.ops.segment_sum(re_h[src] * re_e[:, None], dst, num_segments=num_nodes)
        ir_h = jax.ops.segment_sum(ir_h[src] * ir_e[:, None], dst, num_segments=num_nodes)
    return re_h, ir_h


if __name__ == "__main__":
    key = jax.random.PRNGKey(0)
    k1, k2, k3, k4, k5 = jax.random.split(key, 5)

    N = 40          # number of graph nodes (not a multiple of the row tile)
    F = 16          # per-branch feature dim; in_dim = 2 * F = 32
    in_dim = 2 * F

    re_h = jax.random.normal(k1, (N, F), dtype=jnp.float32)
    ir_h = jax.random.normal(k2, (N, F), dtype=jnp.float32)

    # Random directed graph: adj[dst, src] = 1 for edge src -> dst.
    adj = (jax.random.uniform(k3, (N, N)) < 0.3).astype(jnp.float32)
    adj_np = np.asarray(adj)
    dst_idx, src_idx = np.nonzero(adj_np)
    dst = jnp.asarray(dst_idx, dtype=jnp.int32)
    src = jnp.asarray(src_idx, dtype=jnp.int32)

    # Deterministic sub_gate = nn.Linear(2 * in_dim, 1) parameters.
    bound = 1.0 / np.sqrt(2 * in_dim)
    weight = jax.random.uniform(k4, (1, 2 * in_dim), jnp.float32, -bound, bound)
    bias = jax.random.uniform(k5, (1,), jnp.float32, -bound, bound)

    # tm_max=16 -> TM=16, N_pad=48, grid=(3,): exercises tiling + row padding.
    for iters in (1, 2):
        re_out, ir_out = esgnn_layer_pallas(re_h, ir_h, adj, weight, bias,
                                            iter_lowpass=iters, tm_max=16)
        jax.block_until_ready((re_out, ir_out))

        re_ref, ir_ref = esgnn_layer_ref(re_h, ir_h, src, dst, weight, bias,
                                         num_nodes=N, iter_lowpass=iters)
        np.testing.assert_allclose(np.asarray(re_out), np.asarray(re_ref),
                                   rtol=1e-4, atol=1e-5)
        np.testing.assert_allclose(np.asarray(ir_out), np.asarray(ir_ref),
                                   rtol=1e-4, atol=1e-5)

    print("KERNEL_OK")
</pallas_src>

<mosaic_0001>
module attributes {stable_mosaic.version = 11 : i64} {
  func.func @_norm_kernel(%arg0: i32, %arg1: memref<16x1xf32, #tpu.memory_space<vmem>>, %arg2: memref<1x48xf32, #tpu.memory_space<vmem>>, %arg3: memref<16x48xbf16, #tpu.memory_space<vmem>>, %arg4: memref<16x2xf32, #tpu.memory_space<vmem>>) attributes {dimension_semantics = [#tpu.dimension_semantics<parallel>], iteration_bounds = array<i64: 3>, scalar_prefetch = 0 : i64, scratch_operands = 0 : i64, tpu.core_type = #tpu.core_type<tc>, window_params = [{transform_indices = @transform_0, window_bounds = array<i64: 16, 1>}, {pipeline_mode = #tpu.pipeline_mode<synchronous>, transform_indices = @transform_1, window_bounds = array<i64: 1, 48>}, {transform_indices = @transform_2, window_bounds = array<i64: 16, 48>}, {transform_indices = @transform_3, window_bounds = array<i64: 16, 2>}]} {
    %c0 = arith.constant 0 : index
    %c0_0 = arith.constant 0 : index
    %0 = vector.load %arg3[%c0, %c0_0] : memref<16x48xbf16, #tpu.memory_space<vmem>>, vector<16x48xbf16>
    %1 = arith.extf %0 : vector<16x48xbf16> to vector<16x48xf32>
    %c0_1 = arith.constant 0 : index
    %c0_2 = arith.constant 0 : index
    %2 = vector.load %arg1[%c0_1, %c0_2] : memref<16x1xf32, #tpu.memory_space<vmem>>, vector<16x1xf32>
    %c0_3 = arith.constant 0 : index
    %c0_4 = arith.constant 0 : index
    %3 = vector.load %arg2[%c0_3, %c0_4] : memref<1x48xf32, #tpu.memory_space<vmem>>, vector<1x48xf32>
    %4 = vector.broadcast %2 : vector<16x1xf32> to vector<16x48xf32>
    %5 = vector.broadcast %3 : vector<1x48xf32> to vector<16x48xf32>
    %6 = arith.addf %4, %5 : vector<16x48xf32>
    %7 = math.tanh %6 : vector<16x48xf32>
    %cst = arith.constant dense<0.000000e+00> : vector<16xf32>
    %8 = vector.multi_reduction <add>, %1, %cst [1] : vector<16x48xf32> to vector<16xf32>
    %9 = vector.shape_cast %8 : vector<16xf32> to vector<16x1xf32>
    %10 = arith.mulf %1, %7 : vector<16x48xf32>
    %cst_5 = arith.constant dense<0.000000e+00> : vector<16xf32>
    %11 = vector.multi_reduction <add>, %10, %cst_5 [1] : vector<16x48xf32> to vector<16xf32>
    %12 = vector.shape_cast %11 : vector<16xf32> to vector<16x1xf32>
    %13 = arith.addf %9, %12 : vector<16x1xf32>
    %cst_6 = arith.constant 5.000000e-01 : f32
    %14 = vector.broadcast %cst_6 : f32 to vector<16x1xf32>
    %15 = arith.mulf %14, %13 : vector<16x1xf32>
    %16 = arith.subf %9, %15 : vector<16x1xf32>
    %cst_7 = arith.constant 1.000000e+00 : f32
    %17 = vector.broadcast %cst_7 : f32 to vector<16x1xf32>
    %18 = arith.maximumf %15, %17 : vector<16x1xf32>
    %19 = math.rsqrt %18 : vector<16x1xf32>
    %c0_8 = arith.constant 0 : index
    %c0_9 = arith.constant 0 : index
    %20 = vector.load %arg4[%c0_8, %c0_9] : memref<16x2xf32, #tpu.memory_space<vmem>>, vector<16x1xf32>
    tpu.vector_store %arg4[%c0_8, %c0_9], %19 {strides = array<i32>} : memref<16x2xf32, #tpu.memory_space<vmem>>, vector<16x1xf32>,
    %cst_10 = arith.constant 1.000000e+00 : f32
    %21 = vector.broadcast %cst_10 : f32 to vector<16x1xf32>
    %22 = arith.maximumf %16, %21 : vector<16x1xf32>
    %23 = math.rsqrt %22 : vector<16x1xf32>
    %c0_11 = arith.constant 0 : index
    %c1 = arith.constant 1 : index
    %24 = vector.load %arg4[%c0_11, %c1] : memref<16x2xf32, #tpu.memory_space<vmem>>, vector<16x1xf32>
    tpu.vector_store %arg4[%c0_11, %c1], %23 {strides = array<i32>} : memref<16x2xf32, #tpu.memory_space<vmem>>, vector<16x1xf32>,
    return
  }
  func.func @transform_0(%arg0: i32) -> (i32, i32) {
    %c0_i32 = arith.constant 0 : i32
    %c0_i32_0 = arith.constant 0 : i32
    return %arg0, %c0_i32 : i32, i32
  }
  func.func @transform_1(%arg0: i32) -> (i32, i32) {
    %c0_i32 = arith.constant 0 : i32
    %c0_i32_0 = arith.constant 0 : i32
    %c0_i32_1 = arith.constant 0 : i32
    return %c0_i32, %c0_i32_0 : i32, i32
  }
  func.func @transform_2(%arg0: i32) -> (i32, i32) {
    %c0_i32 = arith.constant 0 : i32
    %c0_i32_0 = arith.constant 0 : i32
    return %arg0, %c0_i32 : i32, i32
  }
  func.func @transform_3(%arg0: i32) -> (i32, i32) {
    %c0_i32 = arith.constant 0 : i32
    %c0_i32_0 = arith.constant 0 : i32
    return %arg0, %c0_i32 : i32, i32
  }
}

</mosaic_0001>

<bundles_post_ra>
// kernel: tpu_custom_call.1
= control target key start
LH: loop header
LB: loop body
LE: loop exit
PB: predicated region body
PF: predicated region fallthrough
CT: control target
= control target key end

     0   :  { %s395_s12 = smov 0   ;;  %s430_s0 = inlined_call_operand.vmem [shape: f32[48,1], index: 0, kind: input, shape index: {}]   ;;  %s431_s1 = inlined_call_operand.vmem [shape: f32[1,48], index: 1, kind: input, shape index: {}]   ;;  %s432_s2 = inlined_call_operand.vmem [shape: bf16[48,48], index: 2, kind: input, shape index: {}]   ;;  %s433_s3 = inlined_call_operand.vmem [shape: f32[48,2], index: 3, kind: output, shape index: {}]  }
   0x1 LB: > { %s326_s13 = sadd.s32 4294967295, %s372_s12   ;;  %p330_p0 = scmp.ge.s32.totalorder %s372_s12, 1  ;;  %s372_s12 = sphi %s395_s12, %s13_s12  }
   0x2   : > { %p149_p1 = scmp.lt.s32.totalorder %s372_s12, 4 }
   0x4   : > { %p150_p2 = pnand %p330_p0, %p149_p1 }
   0x5   : > { %s331_s14 = sshll.u32 (!%p150_p2), %s326_s13, 1  ;;  %v374_v0 = vmov (!%p150_p2), 0   ;;  %vm223_vm0 = vcmask (!%p150_p2), 392192   ;;  %v337_v8 = vld [vmem:[%s431_s1] ss:$0 sm:$0xff] (!%p150_p2)  ;;  %vm248_vm1 = vcmask (!%p150_p2), 7168  }
   0x6   : > { %153 = sbr.rel (%p150_p2) target bundleno = 327 (0x147), region = 32  ;;  %353 = vset.pattern.permute.xlu0 (!%p150_p2), %v374_v0  ;;  %p179_p3 = scmp.lt.s32.totalorder (!%p150_p2), %s331_s14, 5  ;;  %vm255_vm2 = vcmask (!%p150_p2), 15368  }
   0xd   : > { %s435_s14 = smov (!%p179_p3, %s331_s14), 5 }
   0xe   : > { %s332_s15 = sshll.u32 %s435_s14, 3  ;;  %s334_s19 = sshll.u32 %s435_s14, 2 }
   0xf   : > { %s182_s18 = scalar_lea.vmem %s430_s0, %s332_s15  ;;  %s188_s22 = scalar_lea.vmem %s432_s2, %s334_s19 }
  0x10   : > { %v200_v1 = vld [vmem:[%s182_s18] sm:$0xff]  ;;  %v201_v2 = vld [vmem:[%s182_s18 + $0x8] sm:$0xff]  ;;  %s194_s27 = scalar_lea.vmem %s433_s3, %s332_s15 }
  0x11   : > { %205 = vperm.xlu0 %353, %v200_v1   ;;  %v341_v3 = vld [vmem:[%s188_s22] sm:$0xff]  }
  0x12   : > { %v342_v4 = vunpack.c.l.bf16 %v341_v3  ;;  %v343_v6 = vunpack.c.h.bf16 %v341_v3 }
  0x14   : > { %v224_v5 = vsel %vm223_vm0, %v342_v4, 0.0  ;;  %v227_v7 = vsel %vm223_vm0, %v343_v6, 0.0 }
  0x15   : > { %210 = vperm.xlu0 %353, %v201_v2   ;;  %225 = vadd.xlane.f32.xlu1 %v224_v5 }
  0x34   : > { %228 = vadd.xlane.f32.xlu0 %v227_v7 }
  0x90   : > { %v206_v9 = vpop.permute.xlu0 %205 }
  0x91   : > { %v219_v10 = vadd.f32 %v337_v8, %v206_v9 }
  0x93   : > { %354 = vtanh.f32 %v219_v10 }
  0x94   : > { %v211_v11 = vpop.permute.xlu0 %210 }
  0x95   : > { %v220_v12 = vadd.f32 %v337_v8, %v211_v11 }
  0x97   : > { %356 = vtanh.f32 %v220_v12 }
  0x9d   : > { %v355_v13 = vpop.eup %354 }
  0x9e   : > { %v230_v14 = vmul.f32 %v355_v13, %v342_v4 }
  0xa0   : > { %v232_v15 = vsel %vm223_vm0, %v230_v14, 0.0 }
  0xa1   : > { %v357_v16 = vpop.eup %356  ;;  %233 = vadd.xlane.f32.xlu1 %v232_v15 }
  0xa2   : > { %v231_v17 = vmul.f32 %v357_v16, %v343_v6  ;;  %v226_v19 = vpop.xlane.xlu1 %225 }
  0xa4   : > { %v235_v18 = vsel %vm223_vm0, %v231_v17, 0.0 }
  0xa5   : > { %236 = vadd.xlane.f32.xlu1 %v235_v18 }
  0xc1   : > { %v229_v22 = vpop.xlane.xlu0 %228 }
 0x12e   : > { %v234_v20 = vpop.xlane.xlu1 %233 }
 0x12f   : > { %v238_v21 = vadd.f32 %v234_v20, %v226_v19 }
 0x131   : > { %v240_v23 = vmul.f32 0.5, %v238_v21 }
 0x132   : > { %v237_v24 = vpop.xlane.xlu1 %236 }
 0x133   : > { %v242_v25 = vsub.f32 %v226_v19, %v240_v23  ;;  %v244_v26 = vmax.f32 %v240_v23, 1.0  ;;  %v239_v27 = vadd.f32 %v237_v24, %v229_v22 }
 0x135   : > { %358 = vrsqrt.f32 %v244_v26  ;;  %v241_v28 = vmul.f32 0.5, %v239_v27  ;;  %v251_v29 = vmax.f32 %v242_v25, 1.0 }
 0x137   : > { %v243_v30 = vsub.f32 %v229_v22, %v241_v28  ;;  %v245_v31 = vmax.f32 %v241_v28, 1.0 }
 0x139   : > { %360 = vrsqrt.f32 %v245_v31  ;;  %v252_v32 = vmax.f32 %v243_v30, 1.0 }
 0x13a   : > { %362 = vrsqrt.f32 %v251_v29 }
 0x13b   : > { %364 = vrsqrt.f32 %v252_v32 }
 0x13f   : > { %v359_v33 = vpop.eup %358 }
 0x140   : > { %249 = vst.msk [vmem:[%s194_s27] sm:$0xff] %vm248_vm1, %v359_v33 }
 0x143   : > { %v361_v34 = vpop.eup %360 }
 0x144   : > { %v363_v35 = vpop.eup %362  ;;  %250 = vst.msk [vmem:[%s194_s27 + $0x8] sm:$0xff] %vm248_vm1, %v361_v34 }
 0x145   : > { %v365_v36 = vpop.eup %364  ;;  %256 = vst.msk [vmem:[%s194_s27] sm:$0xff] %vm255_vm2, %v363_v35 }
 0x146   : > { %257 = vst.msk [vmem:[%s194_s27 + $0x8] sm:$0xff] %vm255_vm2, %v365_v36 }
 0x147 PF: > { %s13_s12 = sadd.s32 1, %s372_s12  }
 0x148   : > { %p10_p4 = scmp.ge.s32.totalorder %s13_s12, 5  }
 0x14a   :  { %12 = sbr.rel (!%p10_p4) target bundleno = 1 (0x1), region = 65 }

</bundles_post_ra>
